<compile_context>
chip_gen: v7x
topology: tpu7x:2x2x1
jax: 0.10.0
libtpu: 0.0.40
codegen_flags: <defaults>
</compile_context>

<pallas_src>
import functools

import jax
import jax.numpy as jnp
from jax.experimental import pallas as pl
from jax.experimental.pallas import tpu as pltpu

EPS_NORM = 1e-15
EPS_TANH = 1e-7


def _hyper_head_kernel(cls_ref, wp_ref, bp_ref, pwt_ref, yy_ref, logits_ref, emb_ref):
    # cls_ref : (TB, H)   CLS rows (pre-sliced in the wrapper).
    # wp_ref  : (H, Dp)   projection weight (in, out), lane-padded.
    # bp_ref  : (1, Dp)   projection bias, lane-padded.
    # pwt_ref : (Dp, Lp)  poincare prototypes, pre-transposed (contraction-major).
    # yy_ref  : (1, Lp)   precomputed ||w_j||^2 (hoisted; grid-invariant).
    x = cls_ref[...]                                          # (TB, H)

    # projection = Dropout(identity, eval) + Linear(H, H//2); padded lanes stay 0.
    proj = jnp.dot(x, wp_ref[...], preferred_element_type=jnp.float32) + bp_ref[...]

    # expmap0 on the Poincare ball (curvature -1, c = 1): tanh(||u||) * u / ||u||
    sq = jnp.sum(proj * proj, axis=-1, keepdims=True)         # (TB, 1)
    nrm = jnp.maximum(jnp.sqrt(sq), EPS_NORM)
    th = jnp.tanh(nrm)
    emb = proj * (th / nrm)                                   # one divide per row
    emb_ref[...] = emb

    xx = jnp.sum(emb * emb, axis=-1, keepdims=True)           # ||emb||^2 (exact)
    yy = yy_ref[...]                                          # (1, Lp)
    xy = jnp.dot(emb, pwt_ref[...], preferred_element_type=jnp.float32)   # (TB, Lp)

    # Mobius addition (-x) (+) y with c = 1; squared norm of the result expressed
    # with xx, yy, xy only:
    #   A = 1 - 2<x,y> + ||y||^2,  B = 1 - ||x||^2,  dden = 1 - 2<x,y> + ||x||^2||y||^2
    two_xy = 2.0 * xy
    A = 1.0 - two_xy + yy
    B = 1.0 - xx
    dden = 1.0 - two_xy + xx * yy
    num = jnp.maximum(A * A * xx - two_xy * (A * B) + B * B * yy, 0.0)

    # dist(x, y) = 2 * artanh(t), t = sqrt(num)/|dden|; fold t into the log arg:
    #   log((1 + t) / (1 - t)) == log((dd + s) / (dd - s)),  s clamped so t < 1.
    dd = jnp.maximum(jnp.abs(dden), EPS_NORM)
    s = jnp.minimum(jnp.sqrt(num), (1.0 - EPS_TANH) * dd)
    logits_ref[...] = -jnp.log((dd + s) / (dd - s))


def _round_up(n, m):
    return ((n + m - 1) // m) * m


@functools.partial(jax.jit, static_argnames=("tb",))
def hyperbolic_head(last_hidden_state, w_proj, b_proj, poincare_weight, *, tb=None):
    """Hyperbolic classification head.

    last_hidden_state: (B, S, H)  BERT output (CLS slice taken in the wrapper)
    w_proj:            (H, D)     projection weight, (in, out) layout
    b_proj:            (D,)
    poincare_weight:   (L, D)
    Returns (logits (B, L), embeddings (B, D)), float32.
    """
    B, _, H = last_hidden_state.shape
    D = w_proj.shape[1]
    L = poincare_weight.shape[0]

    # Pre-slice the CLS token (explicit f32 cast covers bf16 backbones).
    cls = last_hidden_state[:, 0, :].astype(jnp.float32)      # (B, H)

    # Lane-dense padding: pad D and L up to multiples of 128 lanes so both output
    # stores and the class matmul are full-width (no masked vst.msk).
    Dp = _round_up(D, 128)
    Lp = _round_up(L, 128)

    w_proj_p = jnp.pad(w_proj.astype(jnp.float32), ((0, 0), (0, Dp - D)))
    b_proj_p = jnp.pad(b_proj.astype(jnp.float32).reshape(1, D), ((0, 0), (0, Dp - D)))
    # Pre-transpose (contraction-major) and hoist ||w_j||^2 -- both grid-invariant.
    pw_t = jnp.pad(poincare_weight.astype(jnp.float32).T, ((0, Dp - D), (0, Lp - L)))
    yy = jnp.sum(poincare_weight.astype(jnp.float32) ** 2, axis=-1).reshape(1, L)
    yy_p = jnp.pad(yy, ((0, 0), (0, Lp - L)))

    # Batch tile: >= 2 grid steps when B >= 16 so v7x megacore gets both TCs and
    # the pipeline overlaps DMA with compute; always a multiple of 8 sublanes.
    if tb is None:
        if B >= 16:
            tb = min(256, _round_up(pl.cdiv(B, 2), 8))
        else:
            tb = max(8, _round_up(B, 8))
    tb = max(8, _round_up(tb, 8))

    # Pad B up to a multiple of tb (padded rows compute garbage, sliced off).
    Bp = _round_up(B, tb)
    cls_p = jnp.pad(cls, ((0, Bp - B), (0, 0)))
    grid = (Bp // tb,)

    # Explicit scoped-VMEM budget from the actual (double-buffered) block sizes;
    # cap at 64 MiB so the same setting is portable to v7x.
    blk_bytes = 4 * (
        2 * tb * H                                 # cls input, double-buffered
        + 2 * (H * Dp + Dp + Dp * Lp + Lp)         # resident weights
        + 2 * tb * Lp + 2 * tb * Dp                # outputs, double-buffered
    )
    vmem_limit_bytes = int(min(64 * 1024 * 1024, max(32 * 1024 * 1024, 2 * blk_bytes)))

    logits_p, emb_p = pl.pallas_call(
        _hyper_head_kernel,
        out_shape=(jax.ShapeDtypeStruct((Bp, Lp), jnp.float32),
                   jax.ShapeDtypeStruct((Bp, Dp), jnp.float32)),
        grid_spec=pltpu.PrefetchScalarGridSpec(
            num_scalar_prefetch=0,
            grid=grid,
            in_specs=[
                pl.BlockSpec((tb, H), lambda i: (i, 0)),
                pl.BlockSpec((H, Dp), lambda i: (0, 0)),     # resident weights
                pl.BlockSpec((1, Dp), lambda i: (0, 0)),
                pl.BlockSpec((Dp, Lp), lambda i: (0, 0)),
                pl.BlockSpec((1, Lp), lambda i: (0, 0)),
            ],
            out_specs=[
                pl.BlockSpec((tb, Lp), lambda i: (i, 0)),
                pl.BlockSpec((tb, Dp), lambda i: (i, 0)),
            ],
        ),
        compiler_params=pltpu.CompilerParams(
            dimension_semantics=("parallel",),
            vmem_limit_bytes=vmem_limit_bytes,
        ),
    )(cls_p, w_proj_p, b_proj_p, pw_t, yy_p)

    # Padded rows / lanes hold meaningless values -- slice them off.
    return logits_p[:B, :L], emb_p[:B, :D]


# ---------------- pure-JAX reference (for correctness check) ----------------
def _expmap0(u):
    n = jnp.maximum(jnp.linalg.norm(u, axis=-1, keepdims=True), EPS_NORM)
    return jnp.tanh(n) * u / n


def _reference(cls_output, w_proj, b_proj, poincare_weight):
    proj = cls_output @ w_proj + b_proj
    emb = _expmap0(proj)
    xx = jnp.sum(emb * emb, axis=-1, keepdims=True)
    yy = jnp.sum(poincare_weight * poincare_weight, axis=-1)[None, :]
    xy = emb @ poincare_weight.T
    A = 1.0 - 2.0 * xy + yy
    B = 1.0 - xx
    dden = 1.0 - 2.0 * xy + xx * yy
    num = jnp.maximum(A * A * xx - 2.0 * A * B * xy + B * B * yy, 0.0)
    mob = jnp.sqrt(num) / jnp.maximum(jnp.abs(dden), EPS_NORM)
    t = jnp.clip(mob, 0.0, 1.0 - EPS_TANH)
    dist = jnp.log((1.0 + t) / (1.0 - t))
    return -dist, emb


if __name__ == "__main__":
    # Small shapes consistent with the module's forward.
    batch, seq, hidden, num_labels = 16, 8, 32, 4
    half = hidden // 2

    key = jax.random.PRNGKey(0)
    k_hs, k_w, k_b, k_pw = jax.random.split(key, 4)

    # Stand-in for bert(...).last_hidden_state  (B, S, H)
    last_hidden_state = jax.random.normal(k_hs, (batch, seq, hidden), dtype=jnp.float32)

    # nn.Linear(hidden, hidden // 2): deterministic uniform init a la torch default
    bound_lin = 1.0 / (hidden ** 0.5)
    w_proj = jax.random.uniform(k_w, (hidden, half), jnp.float32, -bound_lin, bound_lin)
    b_proj = jax.random.uniform(k_b, (half,), jnp.float32, -bound_lin, bound_lin)

    # poincare_weight = expmap0(uniform(-0.1, 0.1, (L, H//2)))  -- parameter setup (glue)
    pw_tangent = jax.random.uniform(k_pw, (num_labels, half), jnp.float32, -0.1, 0.1)
    poincare_weight = _expmap0(pw_tangent)

    logits, embeddings = hyperbolic_head(last_hidden_state, w_proj, b_proj, poincare_weight)
    jax.block_until_ready((logits, embeddings))

    cls_output = last_hidden_state[:, 0, :]
    ref_logits, ref_emb = _reference(cls_output, w_proj, b_proj, poincare_weight)
    assert logits.shape == (batch, num_labels)
    assert embeddings.shape == (batch, half)
    assert jnp.allclose(logits, ref_logits, atol=1e-4, rtol=1e-4), "logits mismatch"
    assert jnp.allclose(embeddings, ref_emb, atol=1e-5, rtol=1e-5), "embeddings mismatch"

    print("KERNEL_OK")
</pallas_src>

<mosaic_0001>
module attributes {stable_mosaic.version = 11 : i64} {
  func.func @_hyper_head_kernel(%arg0: i32, %arg1: memref<8x32xf32, #tpu.memory_space<vmem>>, %arg2: memref<32x128xf32, #tpu.memory_space<vmem>>, %arg3: memref<1x128xf32, #tpu.memory_space<vmem>>, %arg4: memref<128x128xf32, #tpu.memory_space<vmem>>, %arg5: memref<1x128xf32, #tpu.memory_space<vmem>>, %arg6: memref<8x128xf32, #tpu.memory_space<vmem>>, %arg7: memref<8x128xf32, #tpu.memory_space<vmem>>) attributes {dimension_semantics = [#tpu.dimension_semantics<parallel>], iteration_bounds = array<i64: 2>, scalar_prefetch = 0 : i64, scratch_operands = 0 : i64, tpu.core_type = #tpu.core_type<tc>, window_params = [{transform_indices = @transform_0, window_bounds = array<i64: 8, 32>}, {pipeline_mode = #tpu.pipeline_mode<synchronous>, transform_indices = @transform_1, window_bounds = array<i64: 32, 128>}, {pipeline_mode = #tpu.pipeline_mode<synchronous>, transform_indices = @transform_2, window_bounds = array<i64: 1, 128>}, {pipeline_mode = #tpu.pipeline_mode<synchronous>, transform_indices = @transform_3, window_bounds = array<i64: 128, 128>}, {pipeline_mode = #tpu.pipeline_mode<synchronous>, transform_indices = @transform_4, window_bounds = array<i64: 1, 128>}, {transform_indices = @transform_5, window_bounds = array<i64: 8, 128>}, {transform_indices = @transform_6, window_bounds = array<i64: 8, 128>}]} {
    %c0 = arith.constant 0 : index
    %c0_0 = arith.constant 0 : index
    %0 = vector.load %arg1[%c0, %c0_0] : memref<8x32xf32, #tpu.memory_space<vmem>>, vector<8x32xf32>
    %c0_1 = arith.constant 0 : index
    %c0_2 = arith.constant 0 : index
    %1 = vector.load %arg2[%c0_1, %c0_2] : memref<32x128xf32, #tpu.memory_space<vmem>>, vector<32x128xf32>
    %cst = arith.constant dense<0.000000e+00> : vector<8x128xf32>
    %2 = tpu.matmul %0, %1, %cst {dimension_numbers = #tpu.dot_dimension_numbers<[1], [0], [0], [1], [0, 0, 1, 1], [], []>} : vector<8x32xf32>, vector<32x128xf32>, vector<8x128xf32> -> vector<8x128xf32>
    %c0_3 = arith.constant 0 : index
    %c0_4 = arith.constant 0 : index
    %3 = vector.load %arg3[%c0_3, %c0_4] : memref<1x128xf32, #tpu.memory_space<vmem>>, vector<1x128xf32>
    %4 = vector.broadcast %3 : vector<1x128xf32> to vector<8x128xf32>
    %5 = arith.addf %2, %4 : vector<8x128xf32>
    %6 = arith.mulf %5, %5 : vector<8x128xf32>
    %cst_5 = arith.constant dense<0.000000e+00> : vector<8xf32>
    %7 = vector.multi_reduction <add>, %6, %cst_5 [1] : vector<8x128xf32> to vector<8xf32>
    %8 = vector.shape_cast %7 : vector<8xf32> to vector<8x1xf32>
    %9 = math.sqrt %8 : vector<8x1xf32>
    %cst_6 = arith.constant 1.000000e-15 : f32
    %10 = vector.broadcast %cst_6 : f32 to vector<8x1xf32>
    %11 = arith.maximumf %9, %10 : vector<8x1xf32>
    %12 = math.tanh %11 : vector<8x1xf32>
    %13 = arith.divf %12, %11 : vector<8x1xf32>
    %14 = vector.broadcast %13 : vector<8x1xf32> to vector<8x128xf32>
    %15 = arith.mulf %5, %14 : vector<8x128xf32>
    %c0_7 = arith.constant 0 : index
    %c0_8 = arith.constant 0 : index
    %16 = vector.load %arg7[%c0_7, %c0_8] : memref<8x128xf32, #tpu.memory_space<vmem>>, vector<8x128xf32>
    tpu.vector_store %arg7[%c0_7, %c0_8], %15 {strides = array<i32>} : memref<8x128xf32, #tpu.memory_space<vmem>>, vector<8x128xf32>,
    %17 = arith.mulf %15, %15 : vector<8x128xf32>
    %cst_9 = arith.constant dense<0.000000e+00> : vector<8xf32>
    %18 = vector.multi_reduction <add>, %17, %cst_9 [1] : vector<8x128xf32> to vector<8xf32>
    %19 = vector.shape_cast %18 : vector<8xf32> to vector<8x1xf32>
    %c0_10 = arith.constant 0 : index
    %c0_11 = arith.constant 0 : index
    %20 = vector.load %arg5[%c0_10, %c0_11] : memref<1x128xf32, #tpu.memory_space<vmem>>, vector<1x128xf32>
    %c0_12 = arith.constant 0 : index
    %c0_13 = arith.constant 0 : index
    %21 = vector.load %arg4[%c0_12, %c0_13] : memref<128x128xf32, #tpu.memory_space<vmem>>, vector<128x128xf32>
    %cst_14 = arith.constant dense<0.000000e+00> : vector<8x128xf32>
    %22 = tpu.matmul %15, %21, %cst_14 {dimension_numbers = #tpu.dot_dimension_numbers<[1], [0], [0], [1], [0, 0, 1, 1], [], []>} : vector<8x128xf32>, vector<128x128xf32>, vector<8x128xf32> -> vector<8x128xf32>
    %cst_15 = arith.constant 2.000000e+00 : f32
    %23 = vector.broadcast %cst_15 : f32 to vector<8x128xf32>
    %24 = arith.mulf %23, %22 : vector<8x128xf32>
    %cst_16 = arith.constant 1.000000e+00 : f32
    %25 = vector.broadcast %cst_16 : f32 to vector<8x128xf32>
    %26 = arith.subf %25, %24 : vector<8x128xf32>
    %27 = vector.broadcast %20 : vector<1x128xf32> to vector<8x128xf32>
    %28 = arith.addf %26, %27 : vector<8x128xf32>
    %cst_17 = arith.constant 1.000000e+00 : f32
    %29 = vector.broadcast %cst_17 : f32 to vector<8x1xf32>
    %30 = arith.subf %29, %19 : vector<8x1xf32>
    %cst_18 = arith.constant 1.000000e+00 : f32
    %31 = vector.broadcast %cst_18 : f32 to vector<8x128xf32>
    %32 = arith.subf %31, %24 : vector<8x128xf32>
    %33 = vector.broadcast %19 : vector<8x1xf32> to vector<8x128xf32>
    %34 = vector.broadcast %20 : vector<1x128xf32> to vector<8x128xf32>
    %35 = arith.mulf %33, %34 : vector<8x128xf32>
    %36 = arith.addf %32, %35 : vector<8x128xf32>
    %37 = arith.mulf %28, %28 : vector<8x128xf32>
    %38 = vector.broadcast %19 : vector<8x1xf32> to vector<8x128xf32>
    %39 = arith.mulf %37, %38 : vector<8x128xf32>
    %40 = vector.broadcast %30 : vector<8x1xf32> to vector<8x128xf32>
    %41 = arith.mulf %28, %40 : vector<8x128xf32>
    %42 = arith.mulf %24, %41 : vector<8x128xf32>
    %43 = arith.subf %39, %42 : vector<8x128xf32>
    %44 = arith.mulf %30, %30 : vector<8x1xf32>
    %45 = vector.broadcast %44 : vector<8x1xf32> to vector<8x128xf32>
    %46 = vector.broadcast %20 : vector<1x128xf32> to vector<8x128xf32>
    %47 = arith.mulf %45, %46 : vector<8x128xf32>
    %48 = arith.addf %43, %47 : vector<8x128xf32>
    %cst_19 = arith.constant 0.000000e+00 : f32
    %49 = vector.broadcast %cst_19 : f32 to vector<8x128xf32>
    %50 = arith.maximumf %48, %49 : vector<8x128xf32>
    %51 = math.absf %36 : vector<8x128xf32>
    %cst_20 = arith.constant 1.000000e-15 : f32
    %52 = vector.broadcast %cst_20 : f32 to vector<8x128xf32>
    %53 = arith.maximumf %51, %52 : vector<8x128xf32>
    %54 = math.sqrt %50 : vector<8x128xf32>
    %cst_21 = arith.constant 0.99999988 : f32
    %55 = vector.broadcast %cst_21 : f32 to vector<8x128xf32>
    %56 = arith.mulf %55, %53 : vector<8x128xf32>
    %57 = arith.minimumf %54, %56 : vector<8x128xf32>
    %58 = arith.addf %53, %57 : vector<8x128xf32>
    %59 = arith.subf %53, %57 : vector<8x128xf32>
    %60 = arith.divf %58, %59 : vector<8x128xf32>
    %61 = math.log %60 : vector<8x128xf32>
    %cst_22 = arith.constant 0.000000e+00 : f32
    %62 = vector.broadcast %cst_22 : f32 to vector<8x128xf32>
    %63 = arith.subf %62, %61 : vector<8x128xf32>
    %c0_23 = arith.constant 0 : index
    %c0_24 = arith.constant 0 : index
    %64 = vector.load %arg6[%c0_23, %c0_24] : memref<8x128xf32, #tpu.memory_space<vmem>>, vector<8x128xf32>
    tpu.vector_store %arg6[%c0_23, %c0_24], %63 {strides = array<i32>} : memref<8x128xf32, #tpu.memory_space<vmem>>, vector<8x128xf32>,
    return
  }
  func.func @transform_0(%arg0: i32) -> (i32, i32) {
    %c0_i32 = arith.constant 0 : i32
    %c0_i32_0 = arith.constant 0 : i32
    return %arg0, %c0_i32 : i32, i32
  }
  func.func @transform_1(%arg0: i32) -> (i32, i32) {
    %c0_i32 = arith.constant 0 : i32
    %c0_i32_0 = arith.constant 0 : i32
    %c0_i32_1 = arith.constant 0 : i32
    return %c0_i32, %c0_i32_0 : i32, i32
  }
  func.func @transform_2(%arg0: i32) -> (i32, i32) {
    %c0_i32 = arith.constant 0 : i32
    %c0_i32_0 = arith.constant 0 : i32
    %c0_i32_1 = arith.constant 0 : i32
    return %c0_i32, %c0_i32_0 : i32, i32
  }
  func.func @transform_3(%arg0: i32) -> (i32, i32) {
    %c0_i32 = arith.constant 0 : i32
    %c0_i32_0 = arith.constant 0 : i32
    %c0_i32_1 = arith.constant 0 : i32
    return %c0_i32, %c0_i32_0 : i32, i32
  }
  func.func @transform_4(%arg0: i32) -> (i32, i32) {
    %c0_i32 = arith.constant 0 : i32
    %c0_i32_0 = arith.constant 0 : i32
    %c0_i32_1 = arith.constant 0 : i32
    return %c0_i32, %c0_i32_0 : i32, i32
  }
  func.func @transform_5(%arg0: i32) -> (i32, i32) {
    %c0_i32 = arith.constant 0 : i32
    %c0_i32_0 = arith.constant 0 : i32
    return %arg0, %c0_i32 : i32, i32
  }
  func.func @transform_6(%arg0: i32) -> (i32, i32) {
    %c0_i32 = arith.constant 0 : i32
    %c0_i32_0 = arith.constant 0 : i32
    return %arg0, %c0_i32 : i32, i32
  }
}

</mosaic_0001>

<bundles_post_ra>
// kernel: hyperbolic_head.1
= control target key start
LH: loop header
LB: loop body
LE: loop exit
PB: predicated region body
PF: predicated region fallthrough
CT: control target
= control target key end

     0   :  { %12 = vsyncpa [#allocation3], 0  ;;  %s1043_s0 = inlined_call_operand.vmem [shape: f32[16,32], index: 0, kind: input, shape index: {}]   ;;  %s1044_s1 = inlined_call_operand.vmem [shape: f32[32,128], index: 1, kind: input, shape index: {}]   ;;  %s1045_s2 = inlined_call_operand.vmem [shape: f32[1,128], index: 2, kind: input, shape index: {}]   ;;  %s1046_s3 = inlined_call_operand.vmem [shape: f32[128,128], index: 3, kind: input, shape index: {}]   ;;  %s1047_s4 = inlined_call_operand.vmem [shape: f32[1,128], index: 4, kind: input, shape index: {}]   ;;  %s1048_s5 = inlined_call_operand.vmem [shape: f32[16,128], index: 5, kind: output, shape index: {0}]   ;;  %s1049_s6 = inlined_call_operand.hbm [shape: f32[16,128], index: 6, kind: output, shape index: {1}]  }
   0x1   :  { %14 = vsyncpa [#allocation3 + $0x1], 0  ;;  %s863_s21 = smov 0   ;;  %s865_s22 = smov 0  }
   0x2   :  { %s867_s23 = smov 0   ;;  %s869_s24 = smov 0  }
   0x3 LB: > { %s884_s25 = sadd.s32 4294967295, %s822_s24   ;;  %s594_s26 = sadd.s32 4294967294, %s822_s24   ;;  %s822_s24 = sphi %s869_s24, %s1055_s24   ;;  %s818_s23 = sphi %s867_s23, %s1054_s23   ;;  %s814_s22 = sphi %s865_s22, %s1053_s22   ;;  %s810_s21 = sphi %s863_s21, %s1052_s21  }
   0x4   : > { %s888_s27 = sadd.s32 1, %s822_s24   ;;  %s163_s28 = sadd.s32 1, %s818_s23 }
   0x5   : > { %s160_s29 = ssub.s32 %s822_s24, %s888_s27  ;;  %p173_p0 = scmp.ne.s32.totalorder %s818_s23, %s814_s22 }
   0x6   : > { %p161_p1 = scmp.eq.s32.totalorder %s160_s29, 0  ;;  %p174_p2 = scmp.eq.s32.totalorder %s884_s25, 1 }
   0x7   : > { %p179_p3 = scmp.ne.s32.totalorder %s814_s22, %s810_s21  ;;  %p180_p4 = scmp.eq.s32.totalorder %s594_s26, 1 }
   0x8   : > { %s899_s30 = scalar_select %p161_p1, %s818_s23, %s163_s28  }
   0x9   : > { %p901_p5 = por %p174_p2, %p173_p0  ;;  %p905_p6 = por %p180_p4, %p179_p3 }
   0xa   : > { %p597_p7 = scmp.ge.s32.totalorder %s822_s24, 1  ;;  %p217_p8 = scmp.lt.s32.totalorder %s822_s24, 3 }
   0xc   : > { %p218_p9 = pnand %p597_p7, %p217_p8 }
   0xd   : > { %v259_v0 = vld [vmem:[%s1044_s1] sm:$0xff] (!%p218_p9)  ;;  %v260_v1 = vld [vmem:[%s1044_s1 + $0x8] sm:$0xff] (!%p218_p9)  ;;  %v261_v2 = vld [vmem:[%s1044_s1 + $0x10] sm:$0xff] (!%p218_p9)  ;;  %v824_v3 = vmov (!%p218_p9), 0.0|0.0   ;;  %vm825_vm0 = vmmov (!%p218_p9), 0   ;;  %v826_v6 = vmov (!%p218_p9), 0.0  }
   0xe   : > { %221 = sbr.rel (%p218_p9) target bundleno = 693 (0x2b5), region = 40  ;;  %676 = vmatprep.subr.bf16.mxu0 (!%p218_p9), %v824_v3  ;;  %v677_v4 = vpack.c.bf16 (!%p218_p9), %v260_v1, %v259_v0  ;;  %v262_v5 = vld [vmem:[%s1044_s1 + $0x18] sm:$0xff] (!%p218_p9)  ;;  %638 = vmatprep.mubr.msk.f32.mxu0 (!%p218_p9), %vm825_vm0, %v826_v6  ;;  %p250_p10 = scmp.lt.s32.totalorder (!%p218_p9), %s884_s25, 1  ;;  %vm270_vm1 = vcmask (!%p218_p9), 261120   ;;  %v601_v9 = vld [vmem:[%s1045_s2] ss:$0 sm:$0xff] (!%p218_p9) }
   0xf   : > { %682 = vmatprep.subr.bf16.mxu1 (!%p218_p9), %v824_v3  ;;  %673 = vmatprep.mubr.msk.f32.mxu1 (!%p218_p9), %vm825_vm0, %v826_v6  ;;  %v680_v7 = vpack.c.bf16 (!%p218_p9), %v262_v5, %v261_v2  ;;  %v364_v14 = vld [vmem:[%s1046_s3] sm:$0xff] (!%p218_p9)  ;;  %v365_v15 = vld [vmem:[%s1046_s3 + $0x8] sm:$0xff] (!%p218_p9)  ;;  %v366_v17 = vld [vmem:[%s1046_s3 + $0x10] sm:$0xff] (!%p218_p9)  ;;  %s247_s15 = sand.u32 (!%p218_p9), 1, %s814_s22   ;;  %s605_s20 = sshll.u32 (!%p218_p9), %s884_s25, 7 }
  0x10   : > { %678 = vmatpush3.bf16.msra.mxu0 (!%p218_p9), %v677_v4  ;;  %v683_v16 = vpack.c.bf16 (!%p218_p9), %v365_v15, %v364_v14  ;;  %v367_v18 = vld [vmem:[%s1046_s3 + $0x18] sm:$0xff] (!%p218_p9)  ;;  %v368_v20 = vld [vmem:[%s1046_s3 + $0x20] sm:$0xff] (!%p218_p9)  ;;  %v369_v21 = vld [vmem:[%s1046_s3 + $0x28] sm:$0xff] (!%p218_p9)  ;;  %s598_s16 = sshll.u32 (!%p218_p9), %s247_s15, 3  ;;  %s999_s9 = scalar_lea.hbm (!%p218_p9), %s1049_s6, %s605_s20 }
  0x11   : > { %679 = vmatprep.subr.bf16.mxu0 (!%p218_p9), %v824_v3  ;;  %v686_v19 = vpack.c.bf16 (!%p218_p9), %v367_v18, %v366_v17  ;;  %v689_v22 = vpack.c.bf16 (!%p218_p9), %v369_v21, %v368_v20  ;;  %v370_v23 = vld [vmem:[%s1046_s3 + $0x30] sm:$0xff] (!%p218_p9)  ;;  %v371_v24 = vld [vmem:[%s1046_s3 + $0x38] sm:$0xff] (!%p218_p9)  ;;  %v372_v26 = vld [vmem:[%s1046_s3 + $0x40] sm:$0xff] (!%p218_p9)  ;;  %s249_s19 = scalar_lea.vmem (!%p218_p9), [#allocation2], %s598_s16  ;;  %s495_s10 = scalar_lea.sflag (!%p218_p9), [#allocation3], %s247_s15 }
  0x12   : > { %684 = vmatpush3.bf16.msra.mxu1 (!%p218_p9), %v683_v16  ;;  %v692_v25 = vpack.c.bf16 (!%p218_p9), %v371_v24, %v370_v23  ;;  %v373_v27 = vld [vmem:[%s1046_s3 + $0x48] sm:$0xff] (!%p218_p9)  ;;  %v374_v29 = vld [vmem:[%s1046_s3 + $0x50] sm:$0xff] (!%p218_p9)  ;;  %v375_v30 = vld [vmem:[%s1046_s3 + $0x58] sm:$0xff] (!%p218_p9)  ;;  %s827_s12 = smov (!%p218_p9), [#allocation2]  }
  0x13   : > { %685 = vmatprep.subr.bf16.mxu1 (!%p218_p9), %v824_v3  ;;  %v695_v28 = vpack.c.bf16 (!%p218_p9), %v373_v27, %v372_v26  ;;  %v698_v31 = vpack.c.bf16 (!%p218_p9), %v375_v30, %v374_v29  ;;  %v376_v32 = vld [vmem:[%s1046_s3 + $0x60] sm:$0xff] (!%p218_p9)  ;;  %v377_v33 = vld [vmem:[%s1046_s3 + $0x68] sm:$0xff] (!%p218_p9)  ;;  %v378_v35 = vld [vmem:[%s1046_s3 + $0x70] sm:$0xff] (!%p218_p9)  ;;  %s764_s13 = sshll.u32 (!%p218_p9), %s827_s12, 4  ;;  %s765_s13 = int_to_ptr.vmem [resolvable:$false] %s764_s13 }
  0x14   : > { %681 = vmatpush3.bf16.msra.mxu0 (!%p218_p9), %v680_v7  ;;  %v701_v34 = vpack.c.bf16 (!%p218_p9), %v377_v33, %v376_v32  ;;  %v379_v36 = vld [vmem:[%s1046_s3 + $0x78] sm:$0xff] (!%p218_p9)  ;;  %s766_s14 = scalar_lea.vmem (!%p218_p9), %s765_s13, 256 }
  0x15   : > { %s927_s17 = scalar_select %p250_p10, %s884_s25, 1  ;;  %v704_v37 = vpack.c.bf16 %v379_v36, %v378_v35 }
  0x16   : > { %687 = vmatpush3.bf16.msra.mxu1 %v686_v19 }
  0x17   : > { %s599_s18 = sshll.u32 %s927_s17, 3  ;;  %688 = vmatprep.subr.bf16.mxu1 %v824_v3 }
  0x18   : > { %s253_s26 = scalar_lea.vmem %s1043_s0, %s599_s18 }
  0x19   : > { %v258_v8 = vld [vmem:[%s253_s26] sm:$0xff]  ;;  %s511_s26 = sshll.u32 %s249_s19, 4  ;;  %s512_s26 = int_to_ptr.vmem [resolvable:$true] %s511_s26 }
  0x1a   : > { %639 = vmatmul.mubr.msk.f32.vlgmr.msra.gmra.mrb[0].mxu0 %vm270_vm1, %v258_v8  ;;  %690 = vmatpush3.bf16.msra.mxu1 %v689_v22  ;;  %s760_s11 = scalar_lea.vmem %s512_s26, 128  ;;  %p767_p0 = scmp.lt.s32.totalorder %s512_s26, %s765_s13 }
  0x1b   : > { %691 = vmatprep.subr.bf16.mxu1 %v824_v3  ;;  %p761_p11 = scmp.ne.s32.totalorder %s512_s26, %s760_s11  ;;  %p768_p1 = scmp.lt.s32.totalorder %s766_s14, %s760_s11 }
  0x1d   : > { %p762_p12 = pnand %p761_p11, %p901_p5  ;;  %p769_p2 = por %p768_p1, %p767_p0 }
  0x1e   : > { %693 = vmatpush3.bf16.msra.mxu1 %v692_v25 }
  0x1f   : > { %694 = vmatprep.subr.bf16.mxu1 %v824_v3  ;;  %p763_p13 = pneg %p762_p12 }
  0x21   : > { %p770_p3 = pnand %p769_p2, %p763_p13 }
  0x22   : > { %696 = vmatpush3.bf16.msra.mxu1 %v695_v28 }
  0x23   : > { %697 = vmatprep.subr.bf16.mxu1 %v824_v3 }
  0x26   : > { %699 = vmatpush3.bf16.msra.mxu1 %v698_v31 }
  0x27   : > { %700 = vmatprep.subr.bf16.mxu1 %v824_v3 }
  0x2a   : > { %702 = vmatpush3.bf16.msra.mxu1 %v701_v34 }
  0x2b   : > { %703 = vmatprep.subr.bf16.mxu1 %v824_v3 }
  0x2e   : > { %705 = vmatpush3.bf16.msra.mxu1 %v704_v37 }
  0xed   : > { %v340_v10 = vpop.f32.mrb[0].mxu0 }
  0xee   : > { %v341_v11 = vadd.f32 %v601_v9, %v340_v10  ;;  %v640_v12 = vpop.f32.mrb[1].mxu0 }
  0xf0   : > { %v344_v13 = vmul.f32 %v341_v11, %v341_v11 }
  0xf2   : > { %345 = vadd.xlane.f32.xlu0 %v344_v13 }
 0x17f   : > { %v346_v38 = vpop.xlane.xlu0 %345 }
 0x180   : > { %748 = vrsqrt.f32 %v346_v38  ;;  %vm349_vm2 = vcmp.eq.f32.partialorder %v346_v38, inf  ;;  %v352_v41 = vand.u32 2147483648, %v346_v38  ;;  %vm351_vm3 = vcmp.eq.f32.partialorder %v346_v38, 0.0 }
 0x18a   : > { %v749_v39 = vpop.eup %748 }
 0x18b   : > { %v348_v40 = vmul.f32 %v749_v39, %v346_v38 }
 0x18d   : > { %v350_v42 = vsel %vm349_vm2, %v346_v38, %v348_v40 }
 0x18e   : > { %v353_v43 = vsel %vm351_vm3, %v352_v41, %v350_v42 }
 0x18f   : > { %v354_v44 = vmax.f32 %v353_v43, 1e-15 }
 0x191   : > { %750 = vtanh.f32 %v354_v44 }
 0x192   : > { %752 = vrcp.f32 %v354_v44 }
 0x19b   : > { %v751_v45 = vpop.eup %750 }
 0x19c   : > { %v753_v46 = vpop.eup %752 }
 0x19d   : > { %v357_v47 = vmul.f32 %v753_v46, %v751_v45 }
 0x19f   : > { %v358_v48 = vmul.f32 %v357_v47, %v341_v11 }
 0x1a1   : > { %674 = vmatmul.mubr.f32.vlgmr.msra.gmra.mrb[0].mxu1 %v358_v48  ;;  %v360_v49 = vmul.f32 %v358_v48, %v358_v48  ;;  %359 = vst [vmem:[%s249_s19] sm:$0xff] %v358_v48 }
 0x1a3   : > { %361 = vadd.xlane.f32.xlu0 %v360_v49 }
 0x1a4   : > { %773 = shalt.err (!%p770_p3)
}
 0x1a5   : > { %s774_s25 = scalar_lea.hbm %s999_s9, 128  ;;  %s778_s19 = scalar_lea.hbm %s1049_s6, 256 }
 0x1a6   : > { %p775_p4 = scmp.ne.s32.totalorder %s999_s9, %s774_s25  ;;  %p779_p9 = scmp.lt.u32.totalorder %s999_s9, %s1049_s6 }
 0x1a7   : > { %p780_p10 = scmp.lt.u32.totalorder %s778_s19, %s774_s25  ;;  %p782_p12 = scmp.lt.u32.totalorder %s774_s25, %s999_s9 }
 0x1a8   : > { %p776_p7 = pnand %p775_p4, %p901_p5 }
 0x1a9   : > { %p781_p11 = por %p780_p10, %p779_p9 }
 0x1aa   : > { %p777_p8 = pneg %p776_p7 }
 0x1ab   : > { %p783_p13 = por %p782_p12, %p781_p11 }
 0x1ad   : > { %p784_p0 = pnand %p783_p13, %p777_p8 }
 0x1af   : > { %787 = shalt.err (!%p784_p0)
}
 0x1b0   : > { %706 = dma.vmem_to_hbm [thread:$0]  (%p901_p5), %s512_s26, 128, %s999_s9, %s495_s10   ;;  %v603_v56 = vld [vmem:[%s1047_s4] ss:$0 sm:$0xff] }
 0x1b1   : > { %s257_s9 = scalar_lea.vmem %s1048_s5, %s599_s18 }
 0x230   : > { %v362_v50 = vpop.xlane.xlu0 %361 }
 0x231   : > { %v459_v54 = vsub.f32 1.0, %v362_v50  ;;  %v460_v3 = vmul.f32 %v603_v56, %v362_v50 }
 0x233   : > { %v467_v58 = vmul.f32 %v459_v54, %v459_v54 }
 0x235   : > { %v468_v63 = vmul.f32 %v603_v56, %v467_v58 }
 0x274   : > { %v446_v51 = vpop.f32.mrb[0].mxu1 }
 0x275   : > { %v450_v52 = vmul.f32 2.0, %v446_v51  ;;  %v675_v53 = vpop.f32.mrb[1].mxu1 }
 0x277   : > { %v451_v55 = vsub.f32 1.0, %v450_v52 }
 0x279   : > { %v458_v57 = vadd.f32 %v603_v56, %v451_v55  ;;  %v461_v4 = vadd.f32 %v460_v3, %v451_v55 }
 0x27b   : > { %v462_v59 = vmul.f32 %v458_v57, %v458_v57  ;;  %v464_v60 = vmul.f32 %v459_v54, %v458_v57  ;;  %v471_v5 = vand.u32 2147483647, %v461_v4 }
 0x27d   : > { %v463_v61 = vmul.f32 %v462_v59, %v362_v50  ;;  %v465_v62 = vmul.f32 %v464_v60, %v450_v52  ;;  %v472_v6 = vmax.f32 %v471_v5, 1e-15 }
 0x27f   : > { %v466_v0 = vsub.f32 %v463_v61, %v465_v62  ;;  %v480_v11 = vmul.f32 0.9999999, %v472_v6 }
 0x281   : > { %v469_v1 = vadd.f32 %v468_v63, %v466_v0 }
 0x283   : > { %v470_v2 = vmax.f32 %v469_v1, 0.0 }
 0x285   : > { %754 = vrsqrt.f32 %v470_v2  ;;  %vm475_vm4 = vcmp.eq.f32.partialorder %v470_v2, inf  ;;  %v478_v9 = vand.u32 2147483648, %v470_v2  ;;  %vm477_vm5 = vcmp.eq.f32.partialorder %v470_v2, 0.0 }
 0x28f   : > { %v755_v7 = vpop.eup %754 }
 0x290   : > { %v474_v8 = vmul.f32 %v755_v7, %v470_v2 }
 0x292   : > { %v476_v10 = vsel %vm475_vm4, %v470_v2, %v474_v8 }
 0x293   : > { %v479_v12 = vsel %vm477_vm5, %v478_v9, %v476_v10 }
 0x294   : > { %v481_v13 = vmin.f32 %v479_v12, %v480_v11 }
 0x296   : > { %v483_v14 = vsub.f32 %v472_v6, %v481_v13  ;;  %v482_v15 = vadd.f32 %v481_v13, %v472_v6 }
 0x298   : > { %756 = vrcp.f32 %v483_v14 }
 0x2a2   : > { %v757_v16 = vpop.eup %756 }
 0x2a3   : > { %v485_v17 = vmul.f32 %v757_v16, %v482_v15 }
 0x2a5   : > { %758 = vlog2.f32 %v485_v17 }
 0x2af   : > { %v759_v18 = vpop.eup %758 }
 0x2b0   : > { %v487_v19 = vmul.f32 0.6931472, %v759_v18 }
 0x2b2   : > { %v488_v20 = vsub.f32 0.0, %v487_v19 }
 0x2b4   : > { %489 = vst [vmem:[%s257_s9] sm:$0xff] %v488_v20 }
 0x2b5 PF: > { %p712_p5 = scmp.ge.s32.totalorder %s822_s24, 2  ;;  %s530_s10 = sand.u32 1, %s810_s21  }
 0x2b6   : > { %s531_s12 = scalar_lea.sflag [#allocation3], %s530_s10 }
 0x2b7   : > { %p709_p1 = pnand %p712_p5, %p905_p6 }
 0x2b9   : > { %805 = dma.done.wait (!%p709_p1), %s531_s12, 128  }
 0x2ba   : > { %807 = vsyncadd (!%p709_p1), %s531_s12, 4294967168  ;;  %p17_p2 = scmp.ge.s32.totalorder %s888_s27, 4   ;;  %s1052_s21 = smov %s814_s22 }
 0x2bb   : > { %s1053_s22 = smov %s818_s23  ;;  %s1054_s23 = smov %s899_s30 }
 0x2bc   : > { %s1055_s24 = smov %s888_s27  ;;  %19 = sbr.rel (!%p17_p2) target bundleno = 3 (0x3), region = 87 }
 0x2c3   :  { %536 = vsyncpa [#allocation3], 1 }
 0x2c4   :  { %538 = vsyncpa [#allocation3 + $0x1], 1 }

</bundles_post_ra>
